<compile_context>
chip_gen: v7x
topology: tpu7x:2x2x1
jax: 0.10.0
libtpu: 0.0.40
codegen_flags: <defaults>
</compile_context>

<pallas_src>
import jax
import jax.numpy as jnp
from jax.experimental import pallas as pl
from jax.experimental.pallas import tpu as pltpu

_LANE = 128


def _round_up(x, m):
    return ((x + m - 1) // m) * m


def _vmem_capacity_bytes():
    try:
        return int(pltpu.get_tpu_info().vmem_capacity_bytes)
    except Exception:
        return 64 * 1024 * 1024  # conservative (v7x-sized) fallback


def _choose_config(n, d):
    """Pick (tile_n rows per grid step, vmem_limit_bytes), generation-aware."""
    vmem_cap = _vmem_capacity_bytes()
    small_vmem = vmem_cap <= 80 * 1024 * 1024       # v7x: 64 MiB per TC
    if small_vmem:
        per_buffer_bytes = 12 * 1024 * 1024         # 2x double-buffer = 24 MiB
        vmem_limit = 48 * 1024 * 1024
    else:                                           # v5e / v6e: 128 MiB per TC
        per_buffer_bytes = 24 * 1024 * 1024         # 2x double-buffer = 48 MiB
        vmem_limit = 80 * 1024 * 1024

    rows = max(per_buffer_bytes // (4 * d), _LANE)
    tile = max(_LANE, (rows // _LANE) * _LANE)

    n_up = _round_up(max(n, 1), _LANE)
    if small_vmem:
        # Keep >= 2 grid steps for large N so ("parallel",) dimension semantics
        # can shard the stream across v7x's two TensorCores.
        tile = min(tile, max(_LANE, _round_up(pl.cdiv(n_up, 2), _LANE)))
    else:
        tile = min(tile, n_up)                      # don't over-pad tiny batches

    # TODO(synk): for very large feature dims (2 * 128 * D * 4 bytes exceeds the
    # VMEM budget), add an "arbitrary" reduction grid axis over D with a VMEM
    # accumulator initialized under pl.when(k == 0).
    return tile, vmem_limit


def ridge_kernel(x_ref, w_ref, b_ref, o_ref):
    # x_ref: (TILE_N, D)    f32 VMEM  -- streamed, double-buffered by Pallas
    # w_ref: (D, 1)         f32 VMEM  -- resident (constant block index)
    # b_ref: (1,)           f32 SMEM  -- scalar bias
    # o_ref: (1, 1, TILE_N) f32 VMEM  -- lane-dense output row for this tile
    s = jnp.dot(x_ref[...], w_ref[...], preferred_element_type=jnp.float32)  # MXU
    o_ref[...] = s.reshape(o_ref.shape) + b_ref[0]


def ridge_forward(x, weight, bias, *, tile_n=None):
    """x: (N, D) f32, weight: (1, D) f32 (PyTorch layout), bias: (1,) f32."""
    x = jnp.asarray(x, jnp.float32)
    N, D = x.shape
    auto_tile, vmem_limit = _choose_config(N, D)
    if tile_n is None:
        tile_n = auto_tile
    assert tile_n % _LANE == 0

    # Ragged tail handled by Pallas partial blocks -- no wrapper-side jnp.pad.
    num_tiles = pl.cdiv(N, tile_n)

    w_col = jnp.asarray(weight, jnp.float32).reshape(D, 1)
    b = jnp.asarray(bias, jnp.float32).reshape(1)

    out = pl.pallas_call(
        ridge_kernel,
        out_shape=jax.ShapeDtypeStruct((num_tiles, 1, tile_n), jnp.float32),
        grid=(num_tiles,),
        in_specs=[
            pl.BlockSpec((tile_n, D), lambda i: (i, 0)),          # x: streamed
            pl.BlockSpec((D, 1), lambda i: (0, 0)),               # w: resident
            pl.BlockSpec(memory_space=pltpu.MemorySpace.SMEM),    # bias scalar
        ],
        out_specs=pl.BlockSpec((1, 1, tile_n), lambda i: (i, 0, 0)),
        compiler_params=pltpu.CompilerParams(
            dimension_semantics=("parallel",),
            vmem_limit_bytes=vmem_limit,
        ),
        cost_estimate=pl.CostEstimate(
            flops=2 * N * D,
            transcendentals=0,
            bytes_accessed=4 * (N * D + D + num_tiles * tile_n),
        ),
    )(x, w_col, b)

    # Lane-dense slab -> (N, 1); padded tail lanes were never valid and are dropped.
    return out.reshape(num_tiles * tile_n)[:N].reshape(N, 1)


def init_params(key, input_dim):
    # Deterministic re-implementation of nn.Linear's default init:
    # U(-1/sqrt(in_features), 1/sqrt(in_features)) for both weight and bias.
    kw, kb = jax.random.split(key)
    bound = 1.0 / jnp.sqrt(jnp.float32(input_dim))
    weight = jax.random.uniform(
        kw, (1, input_dim), jnp.float32, minval=-bound, maxval=bound
    )
    bias = jax.random.uniform(
        kb, (1,), jnp.float32, minval=-bound, maxval=bound
    )
    return weight, bias


if __name__ == "__main__":
    key = jax.random.PRNGKey(0)
    kx, kp = jax.random.split(key)

    N, D = 8, 32                       # small batch / feature dims
    x = jax.random.normal(kx, (N, D), jnp.float32)   # "standard-scaled" input
    weight, bias = init_params(kp, D)

    out = jax.block_until_ready(ridge_forward(x, weight, bias))
    ref = x @ weight.T + bias
    assert out.shape == (N, 1)
    assert jnp.allclose(out, ref, atol=1e-5, rtol=1e-5)

    # Also exercise the multi-tile grid + ragged-tail (no-pad) path.
    x2 = jax.random.normal(jax.random.PRNGKey(1), (300, D), jnp.float32)
    out2 = jax.block_until_ready(ridge_forward(x2, weight, bias, tile_n=128))
    ref2 = x2 @ weight.T + bias
    assert out2.shape == (300, 1)
    assert jnp.allclose(out2, ref2, atol=1e-5, rtol=1e-5)

    print("KERNEL_OK")
</pallas_src>

<mosaic_0001>
module attributes {stable_mosaic.version = 11 : i64} {
  func.func @ridge_kernel(%arg0: i32, %arg1: memref<128x32xf32, #tpu.memory_space<vmem>>, %arg2: memref<32x1xf32, #tpu.memory_space<vmem>>, %arg3: memref<1xf32, #tpu.memory_space<smem>>, %arg4: memref<1x1x128xf32, #tpu.memory_space<vmem>>) attributes {dimension_semantics = [#tpu.dimension_semantics<parallel>], iteration_bounds = array<i64: 1>, scalar_prefetch = 0 : i64, scratch_operands = 0 : i64, tpu.core_type = #tpu.core_type<tc>, window_params = [{transform_indices = @transform_0, window_bounds = array<i64: 128, 32>}, {pipeline_mode = #tpu.pipeline_mode<synchronous>, transform_indices = @transform_1, window_bounds = array<i64: 32, 1>}, {transform_indices = @transform_2, window_bounds = array<i64: 1>}, {transform_indices = @transform_3, window_bounds = array<i64: 1, 1, 128>}]} {
    %c0 = arith.constant 0 : index
    %c0_0 = arith.constant 0 : index
    %0 = vector.load %arg1[%c0, %c0_0] : memref<128x32xf32, #tpu.memory_space<vmem>>, vector<128x32xf32>
    %c0_1 = arith.constant 0 : index
    %c0_2 = arith.constant 0 : index
    %1 = vector.load %arg2[%c0_1, %c0_2] : memref<32x1xf32, #tpu.memory_space<vmem>>, vector<32x1xf32>
    %cst = arith.constant dense<0.000000e+00> : vector<128x1xf32>
    %2 = tpu.matmul %0, %1, %cst {dimension_numbers = #tpu.dot_dimension_numbers<[1], [0], [0], [1], [0, 0, 1, 1], [], []>} : vector<128x32xf32>, vector<32x1xf32>, vector<128x1xf32> -> vector<128x1xf32>
    %3 = vector.shape_cast %2 : vector<128x1xf32> to vector<1x1x128xf32>
    %c0_3 = arith.constant 0 : index
    %4 = memref.load %arg3[%c0_3] : memref<1xf32, #tpu.memory_space<smem>>
    %5 = vector.broadcast %4 : f32 to vector<1x1x128xf32>
    %6 = arith.addf %3, %5 : vector<1x1x128xf32>
    %c0_4 = arith.constant 0 : index
    %c0_5 = arith.constant 0 : index
    %c0_6 = arith.constant 0 : index
    %7 = vector.load %arg4[%c0_4, %c0_5, %c0_6] : memref<1x1x128xf32, #tpu.memory_space<vmem>>, vector<1x1x128xf32>
    tpu.vector_store %arg4[%c0_4, %c0_5, %c0_6], %6 {strides = array<i32>} : memref<1x1x128xf32, #tpu.memory_space<vmem>>, vector<1x1x128xf32>,
    return
  }
  func.func @transform_0(%arg0: i32) -> (i32, i32) {
    %c0_i32 = arith.constant 0 : i32
    %c0_i32_0 = arith.constant 0 : i32
    return %arg0, %c0_i32 : i32, i32
  }
  func.func @transform_1(%arg0: i32) -> (i32, i32) {
    %c0_i32 = arith.constant 0 : i32
    %c0_i32_0 = arith.constant 0 : i32
    %c0_i32_1 = arith.constant 0 : i32
    return %c0_i32, %c0_i32_0 : i32, i32
  }
  func.func @transform_2(%arg0: i32) -> i32 {
    %c0_i32 = arith.constant 0 : i32
    %c0_i32_0 = arith.constant 0 : i32
    return %c0_i32 : i32
  }
  func.func @transform_3(%arg0: i32) -> (i32, i32, i32) {
    %c0_i32 = arith.constant 0 : i32
    %c0_i32_0 = arith.constant 0 : i32
    %c0_i32_1 = arith.constant 0 : i32
    return %arg0, %c0_i32, %c0_i32_0 : i32, i32, i32
  }
}

</mosaic_0001>

<bundles_post_ra>
// kernel: tpu_custom_call.1
= control target key start
LH: loop header
LB: loop body
LE: loop exit
PB: predicated region body
PF: predicated region fallthrough
CT: control target
= control target key end

     0   :  { %vm36_vm0 = vcmask 261120   ;;  %s684_s0 = inlined_call_operand.vmem [shape: f32[8,32], index: 0, kind: input, shape index: {}]   ;;  %s685_s1 = inlined_call_operand.vmem [shape: f32[32,1], index: 1, kind: input, shape index: {}]   ;;  %s686_s2 = inlined_call_operand.<no memory space> [shape: f32[1], index: 2, kind: input, shape index: {}]   ;;  %s687_s3 = inlined_call_operand.hbm [shape: f32[1,1,128], index: 3, kind: output, shape index: {}]  }
   0x1   :  { %v32_v0 = vld [vmem:[%s685_s1] sm:$0xff]  ;;  %v33_v1 = vld [vmem:[%s685_s1 + $0x8] sm:$0xff]  ;;  %v34_v2 = vld [vmem:[%s685_s1 + $0x10] sm:$0xff] }
   0x2   :  { %v507_v3 = vpack.c.bf16 %v33_v1, %v32_v0  ;;  %v35_v4 = vld [vmem:[%s685_s1 + $0x18] sm:$0xff]  ;;  %v16_v5 = vld [vmem:[%s684_s0] sm:$0xff] }
   0x3   :  { %v24_v6 = vld [vmem:[%s684_s0 + $0x40] sm:$0xff]  ;;  %v511_v7 = vpack.c.bf16 %v35_v4, %v34_v2  ;;  %483 = vmatprep.mubr.msk.f32.mxu0 %vm36_vm0, %v16_v5 }
   0x4   :  { %495 = vmatprep.mubr.msk.f32.mxu1 %vm36_vm0, %v24_v6  ;;  %508 = vmatprep.subr.bf16.mxu0 %v507_v3 }
   0x5   :  { %515 = vmatprep.subr.bf16.mxu1 %v507_v3  ;;  %510 = vmatpush3.bf16.msra.mxu0 %v507_v3 }
   0x6   :  { %517 = vmatpush3.bf16.msra.mxu1 %v507_v3  ;;  %512 = vmatprep.subr.bf16.mxu0 %v511_v7 }
   0x7   :  { %516 = vmatprep.subr.bf16.mxu1 %v511_v7 }
   0x8   :  { %9 = vsyncpa [#allocation4], 0  ;;  %v17_v8 = vld [vmem:[%s684_s0 + $0x8] sm:$0xff]  ;;  %v18_v10 = vld [vmem:[%s684_s0 + $0x10] sm:$0xff]  ;;  %v547_v22 = vmov 0   ;;  %v231_v23 = vstv %s686_s2  ;;  %v312_v56 = vlaneseq  ;;  %vm323_vm1 = vcmask 130112  }
   0x9   :  { %514 = vmatpush3.bf16.msra.mxu0 %v511_v7  ;;  %v25_v9 = vld [vmem:[%s684_s0 + $0x48] sm:$0xff]  ;;  %v26_v11 = vld [vmem:[%s684_s0 + $0x50] sm:$0xff]  ;;  %v19_v12 = vld [vmem:[%s684_s0 + $0x18] sm:$0xff]  ;;  %522 = vset.pattern.permute.xlu1 %v547_v22  ;;  %vm330_vm2 = vcmask 195712   ;;  %vm337_vm3 = vcmask 261312   ;;  %vm344_vm4 = vcmask 326912  }
   0xa   :  { %518 = vmatpush3.bf16.msra.mxu1 %v511_v7  ;;  %v27_v13 = vld [vmem:[%s684_s0 + $0x58] sm:$0xff]  ;;  %v20_v14 = vld [vmem:[%s684_s0 + $0x20] sm:$0xff]  ;;  %v21_v16 = vld [vmem:[%s684_s0 + $0x28] sm:$0xff]  ;;  %521 = vset.pattern.permute.xlu0 %v547_v22  ;;  %v313_v57 = vand.u32 127, %v312_v56  ;;  %v650_v60 = vshrl.u32 %v312_v56, 7  ;;  %vm351_vm5 = vcmask 392512  }
   0xb   :  { %v28_v15 = vld [vmem:[%s684_s0 + $0x60] sm:$0xff]  ;;  %v29_v17 = vld [vmem:[%s684_s0 + $0x68] sm:$0xff]  ;;  %v22_v18 = vld [vmem:[%s684_s0 + $0x30] sm:$0xff]  ;;  %vm358_vm6 = vcmask 458112   ;;  %vm365_vm7 = vcmask 523712   ;;  %vm372_vm8 = vcmask 589312  }
   0xc   :  { %484 = vmatmul.mubr.msk.f32.vlgmr.msra.gmra.mrb[0].mxu0 %vm36_vm0, %v17_v8  ;;  %v30_v19 = vld [vmem:[%s684_s0 + $0x70] sm:$0xff]  ;;  %v23_v20 = vld [vmem:[%s684_s0 + $0x38] sm:$0xff]  ;;  %v318_v61 = vadd.s32 4294967288, %v313_v57  ;;  %v325_v0 = vadd.s32 4294967280, %v313_v57  ;;  %v316_v1 = vsub.s32 %v313_v57, %v650_v60  ;;  %v332_v3 = vadd.s32 4294967272, %v313_v57 }
   0xd   :  { %496 = vmatmul.mubr.msk.f32.vlgmr.msra.gmra.mrb[0].mxu1 %vm36_vm0, %v25_v9  ;;  %486 = vmatprep.mubr.msk.f32.mxu0 %vm36_vm0, %v18_v10  ;;  %v31_v21 = vld [vmem:[%s684_s0 + $0x78] sm:$0xff]  ;;  %v339_v7 = vadd.s32 4294967264, %v313_v57  ;;  %v346_v9 = vadd.s32 4294967256, %v313_v57  ;;  %v374_v22 = vadd.s32 4294967224, %v313_v57  ;;  %vm379_vm9 = vcmask 654912   ;;  %s548_s0 = smov [#allocation3]  }
   0xe   :  { %498 = vmatprep.mubr.msk.f32.mxu1 %vm36_vm0, %v26_v11  ;;  %v321_v2 = vsub.s32 %v318_v61, %v650_v60  ;;  %v328_v6 = vsub.s32 %v325_v0, %v650_v60  ;;  %v335_v11 = vsub.s32 %v332_v3, %v650_v60  ;;  %vm386_vm10 = vcmask 720512   ;;  %s431_s2 = sshll.u32 %s548_s0, 4  ;;  %s432_s2 = int_to_ptr.vmem [resolvable:$true] %s431_s2 }
   0xf   :  { %vm393_vm11 = vcmask 786112   ;;  %vm400_vm12 = vcmask 851712   ;;  %vm407_vm13 = vcmask 917312   ;;  %vm414_vm14 = vcmask 982912   ;;  %s523_s25 = scalar_lea.vmem %s432_s2, 16  ;;  %s527_s26 = scalar_lea.vmem %s432_s2, 32 }
  0x10   :  { %487 = vmatmul.mubr.msk.f32.gmra.mrb[2].mxu0 %vm36_vm0, %v19_v12  ;;  %vm421_vm15 = vcmask 1048512   ;;  %p524_p0 = scmp.ne.s32.totalorder %s432_s2, %s523_s25  ;;  %p528_p1 = scmp.lt.s32.totalorder %s432_s2, %s432_s2 }
  0x11   :  { %499 = vmatmul.mubr.msk.f32.gmra.mrb[2].mxu1 %vm36_vm0, %v27_v13  ;;  %489 = vmatprep.mubr.msk.f32.mxu0 %vm36_vm0, %v20_v14  ;;  %p529_p2 = scmp.lt.s32.totalorder %s527_s26, %s523_s25 }
  0x12   :  { %501 = vmatprep.mubr.msk.f32.mxu1 %vm36_vm0, %v28_v15  ;;  %v342_v15 = vsub.s32 %v339_v7, %v650_v60 }
  0x13   :  { %p530_p3 = por %p529_p2, %p528_p1 }
  0x14   :  { %490 = vmatmul.mubr.msk.f32.gmra.mrb[4].mxu0 %vm36_vm0, %v21_v16  ;;  %v360_v16 = vadd.s32 4294967240, %v313_v57 }
  0x15   :  { %502 = vmatmul.mubr.msk.f32.gmra.mrb[4].mxu1 %vm36_vm0, %v29_v17  ;;  %492 = vmatprep.mubr.msk.f32.mxu0 %vm36_vm0, %v22_v18  ;;  %v353_v17 = vadd.s32 4294967248, %v313_v57  ;;  %p531_p4 = pnand %p530_p3, %p524_p0 }
  0x16   :  { %504 = vmatprep.mubr.msk.f32.mxu1 %vm36_vm0, %v30_v19  ;;  %v349_v19 = vsub.s32 %v346_v9, %v650_v60 }
  0x18   :  { %493 = vmatmul.mubr.msk.f32.gmra.mrb[6].mxu0 %vm36_vm0, %v23_v20  ;;  %v367_v20 = vadd.s32 4294967232, %v313_v57 }
  0x19   :  { %505 = vmatmul.mubr.msk.f32.gmra.mrb[6].mxu1 %vm36_vm0, %v31_v21 }
  0xdf   :  { %v485_v24 = vpop.f32.mrb[0].mxu0 }
  0xe0   :  { %v497_v25 = vpop.f32.mrb[0].mxu1  ;;  %v233_v26 = vadd.f32 %v485_v24, %v231_v23  ;;  %v151_v28 = vpop.f32.mrb[1].mxu0  ;;  %v381_v24 = vadd.s32 4294967216, %v313_v57 }
  0xe1   :  { %v241_v27 = vadd.f32 %v497_v25, %v231_v23  ;;  %v191_v29 = vpop.f32.mrb[1].mxu1  ;;  %v232_v32 = vadd.f32 %v231_v23, %v151_v28  ;;  %v363_v28 = vsub.s32 %v360_v16, %v650_v60 }
  0xe2   :  { %268 = vperm.xlu0 %521, %v233_v26   ;;  %v240_v39 = vadd.f32 %v231_v23, %v191_v29  ;;  %v356_v29 = vsub.s32 %v353_v17, %v650_v60 }
  0xe3   :  { %292 = vperm.xlu1 %522, %v241_v27   ;;  %v488_v30 = vpop.f32.mrb[2].mxu0 }
  0xe4   :  { %v500_v31 = vpop.f32.mrb[2].mxu1  ;;  %v235_v33 = vadd.f32 %v488_v30, %v231_v23  ;;  %v161_v34 = vpop.f32.mrb[3].mxu0  ;;  %v388_v30 = vadd.s32 4294967208, %v313_v57 }
  0xe5   :  { %v201_v35 = vpop.f32.mrb[3].mxu1  ;;  %v243_v36 = vadd.f32 %v500_v31, %v231_v23  ;;  %v234_v44 = vadd.f32 %v231_v23, %v161_v34  ;;  %v370_v34 = vsub.s32 %v367_v20, %v650_v60 }
  0xe6   :  { %265 = vperm.xlu0 %521, %v232_v32   ;;  %v242_v45 = vadd.f32 %v231_v23, %v201_v35 }
  0xe7   :  { %274 = vperm.xlu1 %522, %v235_v33   ;;  %v491_v37 = vpop.f32.mrb[4].mxu0  ;;  %v402_v33 = vadd.s32 4294967192, %v313_v57 }
  0xe8   :  { %v503_v38 = vpop.f32.mrb[4].mxu1  ;;  %v171_v40 = vpop.f32.mrb[5].mxu0  ;;  %v237_v48 = vadd.f32 %v491_v37, %v231_v23  ;;  %v377_v37 = vsub.s32 %v374_v22, %v650_v60 }
  0xe9   :  { %v211_v41 = vpop.f32.mrb[5].mxu1  ;;  %v236_v49 = vadd.f32 %v231_v23, %v171_v40  ;;  %v245_v52 = vadd.f32 %v503_v38, %v231_v23  ;;  %v384_v38 = vsub.s32 %v381_v24, %v650_v60 }
  0xea   :  { %289 = vperm.xlu0 %521, %v240_v39   ;;  %v244_v53 = vadd.f32 %v231_v23, %v211_v41 }
  0xeb   :  { %298 = vperm.xlu1 %522, %v243_v36   ;;  %v494_v42 = vpop.f32.mrb[6].mxu0  ;;  %v395_v36 = vadd.s32 4294967200, %v313_v57 }
  0xec   :  { %v506_v43 = vpop.f32.mrb[6].mxu1  ;;  %v181_v46 = vpop.f32.mrb[7].mxu0  ;;  %v239_v50 = vadd.f32 %v494_v42, %v231_v23 }
  0xed   :  { %v221_v47 = vpop.f32.mrb[7].mxu1  ;;  %v238_v51 = vadd.f32 %v231_v23, %v181_v46  ;;  %v247_v54 = vadd.f32 %v506_v43, %v231_v23  ;;  %v416_v43 = vadd.s32 4294967176, %v313_v57 }
  0xee   :  { %295 = vperm.xlu0 %521, %v242_v45   ;;  %v246_v55 = vadd.f32 %v231_v23, %v221_v47  ;;  %v391_v45 = vsub.s32 %v388_v30, %v650_v60  ;;  %v405_v47 = vsub.s32 %v402_v33, %v650_v60 }
  0xef   :  { %271 = vperm.xlu1 %522, %v234_v44   ;;  %v409_v44 = vadd.s32 4294967184, %v313_v57  ;;  %v419_v57 = vsub.s32 %v416_v43, %v650_v60 }
  0xf2   :  { %277 = vperm.xlu0 %521, %v236_v49  }
  0xf3   :  { %280 = vperm.xlu1 %522, %v237_v48  }
  0xf6   :  { %283 = vperm.xlu0 %521, %v238_v51  }
  0xf7   :  { %286 = vperm.xlu1 %522, %v239_v50   ;;  %v398_v50 = vsub.s32 %v395_v36, %v650_v60 }
  0xfa   :  { %301 = vperm.xlu0 %521, %v244_v53  }
  0xfb   :  { %304 = vperm.xlu1 %522, %v245_v52  }
  0xfe   :  { %307 = vperm.xlu0 %521, %v246_v55  }
  0xff   :  { %310 = vperm.xlu1 %522, %v247_v54  }
 0x161   :  { %v269_v59 = vpop.permute.xlu0 %268 }
 0x162   :  { %v648_v58 = vpop.permute.xlu1 %292  ;;  %v322_v10 = vrot.slane %v269_v59, %v321_v2  ;;  %v412_v59 = vsub.s32 %v409_v44, %v650_v60 }
 0x163   :  { %v378_v51 = vrot.slane %v648_v58, %v377_v37 }
 0x165   :  { %v266_v62 = vpop.permute.xlu0 %265 }
 0x166   :  { %v275_v63 = vpop.permute.xlu1 %274  ;;  %v317_v8 = vrot.slane %v266_v62, %v316_v1 }
 0x167   :  { %v336_v23 = vrot.slane %v275_v63, %v335_v11 }
 0x168   :  { %v324_v18 = vsel %vm323_vm1, %v322_v10, %v317_v8 }
 0x169   :  { %v290_v4 = vpop.permute.xlu0 %289 }
 0x16a   :  { %v654_v5 = vpop.permute.xlu1 %298  ;;  %v371_v48 = vrot.slane %v290_v4, %v370_v34 }
 0x16b   :  { %v392_v61 = vrot.slane %v654_v5, %v391_v45 }
 0x16d   :  { %v296_v12 = vpop.permute.xlu0 %295 }
 0x16e   :  { %v272_v13 = vpop.permute.xlu1 %271  ;;  %v385_v55 = vrot.slane %v296_v12, %v384_v38 }
 0x16f   :  { %v329_v14 = vrot.slane %v272_v13, %v328_v6 }
 0x171   :  { %v331_v21 = vsel %vm330_vm2, %v329_v14, %v324_v18  ;;  %v278_v26 = vpop.permute.xlu0 %277 }
 0x172   :  { %v281_v25 = vpop.permute.xlu1 %280  ;;  %v343_v27 = vrot.slane %v278_v26, %v342_v15  ;;  %v338_v32 = vsel %vm337_vm3, %v336_v23, %v331_v21 }
 0x173   :  { %v350_v31 = vrot.slane %v281_v25, %v349_v19 }
 0x174   :  { %v345_v35 = vsel %vm344_vm4, %v343_v27, %v338_v32 }
 0x175   :  { %v284_v40 = vpop.permute.xlu0 %283  ;;  %v352_v46 = vsel %vm351_vm5, %v350_v31, %v345_v35 }
 0x176   :  { %v287_v39 = vpop.permute.xlu1 %286  ;;  %v357_v42 = vrot.slane %v284_v40, %v356_v29 }
 0x177   :  { %v364_v41 = vrot.slane %v287_v39, %v363_v28 }
 0x178   :  { %v359_v49 = vsel %vm358_vm6, %v357_v42, %v352_v46 }
 0x179   :  { %v366_v52 = vsel %vm365_vm7, %v364_v41, %v359_v49  ;;  %v302_v54 = vpop.permute.xlu0 %301 }
 0x17a   :  { %v305_v53 = vpop.permute.xlu1 %304  ;;  %v373_v56 = vsel %vm372_vm8, %v371_v48, %v366_v52  ;;  %v399_v0 = vrot.slane %v302_v54, %v398_v50 }
 0x17b   :  { %v380_v62 = vsel %vm379_vm9, %v378_v51, %v373_v56  ;;  %v406_v1 = vrot.slane %v305_v53, %v405_v47 }
 0x17c   :  { %v387_v63 = vsel %vm386_vm10, %v385_v55, %v380_v62 }
 0x17d   :  { %v394_v58 = vsel %vm393_vm11, %v392_v61, %v387_v63  ;;  %v308_v3 = vpop.permute.xlu0 %307 }
 0x17e   :  { %v311_v2 = vpop.permute.xlu1 %310  ;;  %v401_v4 = vsel %vm400_vm12, %v399_v0, %v394_v58  ;;  %v413_v7 = vrot.slane %v308_v3, %v412_v59 }
 0x17f   :  { %v420_v6 = vrot.slane %v311_v2, %v419_v57  ;;  %v408_v8 = vsel %vm407_vm13, %v406_v1, %v401_v4 }
 0x180   :  { %v415_v60 = vsel %vm414_vm14, %v413_v7, %v408_v8 }
 0x181   :  { %v422_v5 = vsel %vm421_vm15, %v420_v6, %v415_v60 }
 0x182   :  { %424 = vst [vmem:[#allocation3] sm:$0x1] %v422_v5 }
 0x183   :  { %534 = shalt.err (!%p531_p4)
}
 0x184   :  { %s535_s29 = scalar_lea.hbm %s687_s3, 16 }
 0x185   :  { %p536_p5 = scmp.ne.s32.totalorder %s687_s3, %s535_s29  ;;  %p539_p6 = scmp.lt.u32.totalorder %s535_s29, %s687_s3 }
 0x187   :  { %p541_p7 = pnand %p539_p6, %p536_p5 }
 0x189   :  { %544 = shalt.err (!%p541_p7)
}
 0x18a   :  { %434 = dma.vmem_to_hbm [thread:$0]  %s432_s2, 16, %s687_s3, [#allocation4]  }
 0x18b   :  { %545 = dma.done.wait [#allocation4], 16  }
 0x18c   :  { %546 = vsyncadd [#allocation4], 4294967280 }
 0x18d   :  { %438 = vsyncpa [#allocation4], 1 }

</bundles_post_ra>
